<compile_context>
chip_gen: v6e
topology: v6e:2x2x1
jax: 0.10.0
libtpu: 0.0.40
codegen_flags: <defaults>
</compile_context>

<pallas_src>
import functools

import jax
import jax.numpy as jnp
from jax.experimental import pallas as pl
from jax.experimental.pallas import tpu as pltpu


def _contrastive_loss_kernel(c_ref, yt_ref, yd_ref, out_ref, *,
                             inv_k, batch, block_b):
    # c_ref, yt_ref: (Bb, T, D);  yd_ref: (Bb, N, D);  out_ref: (1, 1, 1)
    eps2 = jnp.float32(1e-16)  # (1e-8)^2 -- clamp applied to squared norms

    c = c_ref[...]
    yt = yt_ref[...]
    yd = yd_ref[...]

    # f32 working views for norm / exp / log math (no-op for f32 inputs;
    # cast+mul+reduce fuse per-vreg, so no large standalone f32 copies).
    c32 = c.astype(jnp.float32)
    yt32 = yt.astype(jnp.float32)

    # Inverse norms via EUP rsqrt on lane-dense 2-D vectors.
    # rsqrt(max(ss, eps^2)) == 1 / max(||x||, eps)  (per-vector eps clamp).
    c_inv = jax.lax.rsqrt(jnp.maximum(jnp.sum(c32 * c32, axis=-1), eps2))       # (Bb, T)
    yt_inv = jax.lax.rsqrt(jnp.maximum(jnp.sum(yt32 * yt32, axis=-1), eps2))    # (Bb, T)
    yd_inv = jax.lax.rsqrt(
        jnp.maximum(jnp.sum(jnp.square(yd.astype(jnp.float32)), axis=-1), eps2))  # (Bb, N)

    # Fold 1/temperature into the per-row scale once.
    c_scale = c_inv * jnp.float32(inv_k)                                         # (Bb, T)

    # Positive logit: cos(y_t, c) / k  -> (Bb, T)
    pos_logit = jnp.sum(yt32 * c32, axis=-1) * c_scale * yt_inv

    # Negative logits: batched MXU matmul contracting the shared last dim
    # (keeps the (B, N, D) HBM layout; scale applied after the matmul).
    dots = jnp.einsum('btd,bnd->btn', c, yd,
                      preferred_element_type=jnp.float32)                        # (Bb, T, N)
    neg_logit = dots * c_scale[:, :, None] * yd_inv[:, None, :]                  # (Bb, T, N)

    # Max-shifted log-sum-exp:
    #   denom = sum_n exp(neg) + exp(pos) = exp(m) * (sum_n exp(neg-m) + exp(pos-m))
    #   per   = log(denom) - pos_logit   = m + log(shifted) - pos_logit
    m = jnp.maximum(jnp.max(neg_logit, axis=-1), pos_logit)                      # (Bb, T)
    shifted = (jnp.sum(jnp.exp(neg_logit - m[:, :, None]), axis=-1)
               + jnp.exp(pos_logit - m))                                         # (Bb, T)
    per = m + jnp.log(shifted) - pos_logit                                       # (Bb, T)

    # Mask rows past the true batch size (grid may over-cover B; OOB tile rows
    # hold unspecified values, so zero their contribution before the reduce).
    b = pl.program_id(0)
    valid = batch - b * block_b
    row_ids = jax.lax.broadcasted_iota(jnp.int32, per.shape, 0)
    per = jnp.where(row_ids < valid, per, 0.0)

    out_ref[...] = jnp.full((1, 1, 1), jnp.sum(per), dtype=jnp.float32)


def _vmem_params():
    """(per-step VMEM footprint budget, vmem_limit_bytes) for this generation."""
    try:
        cap = pltpu.get_tpu_info().vmem_capacity_bytes
    except Exception:
        cap = 64 << 20                      # unknown: assume the tight (v7x) budget
    if cap >= (96 << 20):                   # v5e / v6e: 128 MiB VMEM per core
        return 56 << 20, 100 << 20
    return 36 << 20, 48 << 20               # v7x: 64 MiB per TensorCore


def _choose_block_b(B, T, N, D, itemsize, budget_bytes):
    # Per-batch-element VMEM footprint estimate:
    #   double-buffered input tiles (original dtype) + f32 working temps for
    #   c / y_t + fused squared-product temp for the negatives' norms +
    #   (T, N) dots/logits/exp/shift temporaries.
    per_b = (2 * (2 * T * D + N * D) * itemsize
             + 2 * T * D * 4
             + N * D * 4
             + 4 * T * N * 4)
    bb = max(1, min(B, budget_bytes // max(per_b, 1)))
    num_chunks = pl.cdiv(B, bb)
    if B >= 2:
        # >= 2 chunks so v7x can shard across both TensorCores; prefer an even
        # count (best effort) so neither core takes a trailing extra step.
        num_chunks = max(num_chunks, 2)
        if (num_chunks % 2) and num_chunks < B:
            num_chunks += 1
        bb = pl.cdiv(B, num_chunks)
        num_chunks = pl.cdiv(B, bb)
    return bb, num_chunks


@functools.partial(jax.jit, static_argnames=("temperature",))
def contrastive_loss(c, y_t, y_distraction, temperature=1.0):
    B, T, D = c.shape
    _, N, _ = y_distraction.shape
    budget_bytes, vmem_limit = _vmem_params()
    bb, num_chunks = _choose_block_b(B, T, N, D,
                                     jnp.dtype(c.dtype).itemsize, budget_bytes)

    kernel = functools.partial(_contrastive_loss_kernel,
                               inv_k=float(1.0 / temperature),
                               batch=B, block_b=bb)

    partials = pl.pallas_call(
        kernel,
        out_shape=jax.ShapeDtypeStruct((num_chunks, 1, 1), jnp.float32),
        grid_spec=pltpu.PrefetchScalarGridSpec(
            num_scalar_prefetch=0,
            grid=(num_chunks,),
            in_specs=[
                pl.BlockSpec((bb, T, D), lambda b: (b, 0, 0)),
                pl.BlockSpec((bb, T, D), lambda b: (b, 0, 0)),
                pl.BlockSpec((bb, N, D), lambda b: (b, 0, 0)),
            ],
            out_specs=pl.BlockSpec((1, 1, 1), lambda b: (b, 0, 0)),
        ),
        compiler_params=pltpu.CompilerParams(
            dimension_semantics=("parallel",),   # both TCs on v7x; neutral elsewhere
            vmem_limit_bytes=vmem_limit,
        ),
    )(c, y_t, y_distraction)

    return jnp.sum(partials) / jnp.float32(B * T)


def _reference(c, y_t, y_d, k=1.0, eps=1e-8):
    def cos(a, b):
        an = jnp.maximum(jnp.linalg.norm(a, axis=-1, keepdims=True), eps)
        bn = jnp.maximum(jnp.linalg.norm(b, axis=-1, keepdims=True), eps)
        return jnp.sum((a / an) * (b / bn), axis=-1)
    q_t = jnp.exp(cos(y_t, c) / k)
    q_neg = jnp.exp(cos(c[:, :, None, :], y_d[:, None, :, :]) / k)
    denom = q_neg.sum(-1) + q_t
    return -jnp.mean(jnp.log(q_t / denom))


if __name__ == "__main__":
    key = jax.random.PRNGKey(0)
    k1, k2, k3 = jax.random.split(key, 3)
    B, T, N, D = 2, 8, 8, 32
    c = jax.random.normal(k1, (B, T, D), dtype=jnp.float32)
    y_t = jax.random.normal(k2, (B, T, D), dtype=jnp.float32)
    y_d = jax.random.normal(k3, (B, N, D), dtype=jnp.float32)

    loss = contrastive_loss(c, y_t, y_d, temperature=1.0)
    jax.block_until_ready(loss)

    ref = _reference(c, y_t, y_d, k=1.0)
    assert jnp.allclose(loss, ref, rtol=1e-5, atol=1e-5), (loss, ref)
    print("KERNEL_OK")
</pallas_src>

<mosaic_0001>
module attributes {stable_mosaic.version = 11 : i64} {
  func.func @_contrastive_loss_kernel(%arg0: i32, %arg1: memref<1x8x32xf32, #tpu.memory_space<vmem>>, %arg2: memref<1x8x32xf32, #tpu.memory_space<vmem>>, %arg3: memref<1x8x32xf32, #tpu.memory_space<vmem>>, %arg4: memref<1x1x1xf32, #tpu.memory_space<vmem>>) attributes {dimension_semantics = [#tpu.dimension_semantics<parallel>], iteration_bounds = array<i64: 2>, scalar_prefetch = 0 : i64, scratch_operands = 0 : i64, tpu.core_type = #tpu.core_type<tc>, window_params = [{transform_indices = @transform_0, window_bounds = array<i64: 1, 8, 32>}, {transform_indices = @transform_1, window_bounds = array<i64: 1, 8, 32>}, {transform_indices = @transform_2, window_bounds = array<i64: 1, 8, 32>}, {transform_indices = @transform_3, window_bounds = array<i64: 1, 1, 1>}]} {
    %c0 = arith.constant 0 : index
    %c0_0 = arith.constant 0 : index
    %c0_1 = arith.constant 0 : index
    %0 = vector.load %arg1[%c0, %c0_0, %c0_1] : memref<1x8x32xf32, #tpu.memory_space<vmem>>, vector<1x8x32xf32>
    %c0_2 = arith.constant 0 : index
    %c0_3 = arith.constant 0 : index
    %c0_4 = arith.constant 0 : index
    %1 = vector.load %arg2[%c0_2, %c0_3, %c0_4] : memref<1x8x32xf32, #tpu.memory_space<vmem>>, vector<1x8x32xf32>
    %c0_5 = arith.constant 0 : index
    %c0_6 = arith.constant 0 : index
    %c0_7 = arith.constant 0 : index
    %2 = vector.load %arg3[%c0_5, %c0_6, %c0_7] : memref<1x8x32xf32, #tpu.memory_space<vmem>>, vector<1x8x32xf32>
    %3 = arith.mulf %0, %0 : vector<1x8x32xf32>
    %cst = arith.constant dense<0.000000e+00> : vector<1x8xf32>
    %4 = vector.multi_reduction <add>, %3, %cst [2] : vector<1x8x32xf32> to vector<1x8xf32>
    %cst_8 = arith.constant 1.000000e-16 : f32
    %5 = vector.broadcast %cst_8 : f32 to vector<1x8xf32>
    %6 = arith.maximumf %4, %5 : vector<1x8xf32>
    %7 = math.rsqrt %6 : vector<1x8xf32>
    %8 = arith.mulf %1, %1 : vector<1x8x32xf32>
    %cst_9 = arith.constant dense<0.000000e+00> : vector<1x8xf32>
    %9 = vector.multi_reduction <add>, %8, %cst_9 [2] : vector<1x8x32xf32> to vector<1x8xf32>
    %cst_10 = arith.constant 1.000000e-16 : f32
    %10 = vector.broadcast %cst_10 : f32 to vector<1x8xf32>
    %11 = arith.maximumf %9, %10 : vector<1x8xf32>
    %12 = math.rsqrt %11 : vector<1x8xf32>
    %13 = arith.mulf %2, %2 : vector<1x8x32xf32>
    %cst_11 = arith.constant dense<0.000000e+00> : vector<1x8xf32>
    %14 = vector.multi_reduction <add>, %13, %cst_11 [2] : vector<1x8x32xf32> to vector<1x8xf32>
    %cst_12 = arith.constant 1.000000e-16 : f32
    %15 = vector.broadcast %cst_12 : f32 to vector<1x8xf32>
    %16 = arith.maximumf %14, %15 : vector<1x8xf32>
    %17 = math.rsqrt %16 : vector<1x8xf32>
    %cst_13 = arith.constant 1.000000e+00 : f32
    %18 = vector.broadcast %cst_13 : f32 to vector<1x8xf32>
    %19 = arith.mulf %7, %18 : vector<1x8xf32>
    %20 = arith.mulf %1, %0 : vector<1x8x32xf32>
    %cst_14 = arith.constant dense<0.000000e+00> : vector<1x8xf32>
    %21 = vector.multi_reduction <add>, %20, %cst_14 [2] : vector<1x8x32xf32> to vector<1x8xf32>
    %22 = arith.mulf %21, %19 : vector<1x8xf32>
    %23 = arith.mulf %22, %12 : vector<1x8xf32>
    "tpu.trace_start"() <{level = 10 : i32, message = "btd,bnd->btn"}> : () -> ()
    %cst_15 = arith.constant dense<0.000000e+00> : vector<1x8x8xf32>
    %24 = tpu.matmul %0, %2, %cst_15 {dimension_numbers = #tpu.dot_dimension_numbers<[2], [2], [1], [1], [0, 0, 0, 1, 1, 1], [0], [0]>} : vector<1x8x32xf32>, vector<1x8x32xf32>, vector<1x8x8xf32> -> vector<1x8x8xf32>
    "tpu.trace_stop"() : () -> ()
    %25 = vector.shape_cast %19 : vector<1x8xf32> to vector<1x8x1xf32>
    %26 = vector.broadcast %25 : vector<1x8x1xf32> to vector<1x8x8xf32>
    %27 = arith.mulf %24, %26 : vector<1x8x8xf32>
    %28 = vector.shape_cast %17 : vector<1x8xf32> to vector<1x1x8xf32>
    %29 = vector.broadcast %28 : vector<1x1x8xf32> to vector<1x8x8xf32>
    %30 = arith.mulf %27, %29 : vector<1x8x8xf32>
    %cst_16 = arith.constant dense<0xFF800000> : vector<1x8xf32>
    %31 = vector.multi_reduction <maximumf>, %30, %cst_16 [2] : vector<1x8x8xf32> to vector<1x8xf32>
    %32 = arith.maximumf %31, %23 : vector<1x8xf32>
    %33 = vector.shape_cast %32 : vector<1x8xf32> to vector<1x8x1xf32>
    %34 = vector.broadcast %33 : vector<1x8x1xf32> to vector<1x8x8xf32>
    %35 = arith.subf %30, %34 : vector<1x8x8xf32>
    %36 = math.exp %35 : vector<1x8x8xf32>
    %cst_17 = arith.constant dense<0.000000e+00> : vector<1x8xf32>
    %37 = vector.multi_reduction <add>, %36, %cst_17 [2] : vector<1x8x8xf32> to vector<1x8xf32>
    %38 = arith.subf %23, %32 : vector<1x8xf32>
    %39 = math.exp %38 : vector<1x8xf32>
    %40 = arith.addf %37, %39 : vector<1x8xf32>
    %41 = math.log %40 : vector<1x8xf32>
    %42 = arith.addf %32, %41 : vector<1x8xf32>
    %43 = arith.subf %42, %23 : vector<1x8xf32>
    %c1_i32 = arith.constant 1 : i32
    %44 = arith.muli %arg0, %c1_i32 : i32
    %c2_i32 = arith.constant 2 : i32
    %45 = arith.subi %c2_i32, %44 : i32
    %46 = tpu.iota {dimensions = array<i32: 0>} : vector<1x8xi32>
    %47 = vector.broadcast %45 : i32 to vector<1x8xi32>
    %48 = arith.cmpi slt, %46, %47 : vector<1x8xi32>
    %cst_18 = arith.constant 0.000000e+00 : f32
    %49 = vector.broadcast %cst_18 : f32 to vector<1x8xf32>
    %50 = arith.select %48, %43, %49 : vector<1x8xi1>, vector<1x8xf32>
    %51 = vector.shape_cast %50 : vector<1x8xf32> to vector<1x1x8xf32>
    %cst_19 = arith.constant dense<0.000000e+00> : vector<1xf32>
    %52 = vector.multi_reduction <add>, %51, %cst_19 [1, 2] : vector<1x1x8xf32> to vector<1xf32>
    %53 = vector.shape_cast %52 : vector<1xf32> to vector<1x1x1xf32>
    %54 = vector.extract %53[0, 0, 0] : f32 from vector<1x1x1xf32>
    %55 = vector.broadcast %54 : f32 to vector<1x1x1xf32>
    %c0_20 = arith.constant 0 : index
    %c0_21 = arith.constant 0 : index
    %c0_22 = arith.constant 0 : index
    %56 = vector.load %arg4[%c0_20, %c0_21, %c0_22] : memref<1x1x1xf32, #tpu.memory_space<vmem>>, vector<1x1x1xf32>
    tpu.vector_store %arg4[%c0_20, %c0_21, %c0_22], %55 {strides = array<i32>} : memref<1x1x1xf32, #tpu.memory_space<vmem>>, vector<1x1x1xf32>,
    return
  }
  func.func @transform_0(%arg0: i32) -> (i32, i32, i32) {
    %c0_i32 = arith.constant 0 : i32
    %c0_i32_0 = arith.constant 0 : i32
    %c0_i32_1 = arith.constant 0 : i32
    return %arg0, %c0_i32, %c0_i32_0 : i32, i32, i32
  }
  func.func @transform_1(%arg0: i32) -> (i32, i32, i32) {
    %c0_i32 = arith.constant 0 : i32
    %c0_i32_0 = arith.constant 0 : i32
    %c0_i32_1 = arith.constant 0 : i32
    return %arg0, %c0_i32, %c0_i32_0 : i32, i32, i32
  }
  func.func @transform_2(%arg0: i32) -> (i32, i32, i32) {
    %c0_i32 = arith.constant 0 : i32
    %c0_i32_0 = arith.constant 0 : i32
    %c0_i32_1 = arith.constant 0 : i32
    return %arg0, %c0_i32, %c0_i32_0 : i32, i32, i32
  }
  func.func @transform_3(%arg0: i32) -> (i32, i32, i32) {
    %c0_i32 = arith.constant 0 : i32
    %c0_i32_0 = arith.constant 0 : i32
    %c0_i32_1 = arith.constant 0 : i32
    return %arg0, %c0_i32, %c0_i32_0 : i32, i32, i32
  }
}

</mosaic_0001>

<bundles_post_ra>
// kernel: contrastive_loss.1
= control target key start
LH: loop header
LB: loop body
LE: loop exit
PB: predicated region body
PF: predicated region fallthrough
CT: control target
= control target key end

     0   :  { %8 = vsyncpa [#allocation3], 0  ;;  %s949_s0 = inlined_call_operand.hbm [shape: f32[2,8,32], index: 0, kind: input, shape index: {}]   ;;  %s950_s1 = inlined_call_operand.hbm [shape: f32[2,8,32], index: 1, kind: input, shape index: {}]   ;;  %s951_s2 = inlined_call_operand.hbm [shape: f32[2,8,32], index: 2, kind: input, shape index: {}]   ;;  %s952_s3 = inlined_call_operand.vmem [shape: f32[2,1,1], index: 3, kind: output, shape index: {}]  }
   0x1   :  { %10 = vsyncpa [#allocation3 + $0x1], 0 }
   0x2   :  { %11 = vsyncpa [#allocation5], 0 }
   0x3   :  { %13 = vsyncpa [#allocation5 + $0x1], 0  ;;  %s766_s12 = smov 0   ;;  %s768_s13 = smov 0  }
   0x4   :  { %s770_s14 = smov 0   ;;  %s772_s15 = smov 0  }
   0x5 LB: > { %s785_s16 = sadd.s32 4294967295, %s739_s15   ;;  %s788_s17 = sadd.s32 1, %s739_s15   ;;  %s739_s15 = sphi %s772_s15, %s965_s15   ;;  %s735_s14 = sphi %s770_s14, %s964_s14   ;;  %s731_s13 = sphi %s768_s13, %s963_s13   ;;  %s727_s12 = sphi %s766_s12, %s962_s12  }
   0x6   : > { %s23_s18 = ssub.s32 %s739_s15, %s788_s17  ;;  %s26_s19 = sadd.s32 1, %s735_s14 }
   0x7   : > { %p24_p0 = scmp.eq.s32.totalorder %s23_s18, 0  ;;  %p33_p1 = scmp.ne.s32.totalorder %s735_s14, %s731_s13 }
   0x8   : > { %p34_p2 = scmp.eq.s32.totalorder %s739_s15, 0  ;;  %p39_p3 = scmp.ne.s32.totalorder %s731_s13, %s727_s12 }
   0x9   : > { %s798_s20 = scalar_select %p24_p0, %s735_s14, %s26_s19  }
   0xa   : > { %p35_p4 = por %p34_p2, %p33_p1  ;;  %p40_p5 = scmp.eq.s32.totalorder %s785_s16, 0 }
   0xb   : > { %p570_p6 = scmp.lt.s32.totalorder %s739_s15, 2  ;;  %s141_s22 = sand.u32 1, %s735_s14  }
   0xc   : > { %p802_p7 = por %p40_p5, %p39_p3  ;;  %s809_s23 = sshll.u32 %s141_s22, 3 }
   0xd   : > { %s812_s24 = sshll.u32 %s739_s15, 7  ;;  %p814_p8 = pnand %p570_p6, %p35_p4 }
   0xe   : > { %s954_s21 = scalar_select %p802_p7, 1, 0 }
   0xf   : > { %s159_s26 = sand.u32 1, %s739_s15   ;;  %s823_s29 = scalar_lea.hbm %s950_s1, %s812_s24 }
  0x10   : > { %s163_s30 = scalar_lea.vmem [#allocation4], %s809_s23  ;;  %s828_s5 = scalar_lea.sflag [#allocation5], %s159_s26 }
  0x11   : > { %s170_s4 = sshll.u32 %s163_s30, 4  ;;  %s617_s6 = scalar_lea.hbm %s823_s29, 128  ;;  %s171_s4 = int_to_ptr.vmem [resolvable:$true] %s170_s4 }
  0x12   : > { %p618_p11 = scmp.ne.s32.totalorder %s823_s29, %s617_s6  ;;  %p834_p12 = pneg %p814_p8 }
  0x13   : > { %s622_s10 = scalar_lea.hbm %s950_s1, 256  ;;  %p623_p1 = scmp.lt.s32.totalorder %s823_s29, %s950_s1 }
  0x14   : > { %p620_p13 = pnand %p834_p12, %p618_p11  ;;  %p624_p2 = scmp.lt.s32.totalorder %s622_s10, %s617_s6 }
  0x16   : > { %p621_p0 = pneg %p620_p13  ;;  %p625_p3 = por %p624_p2, %p623_p1 }
  0x18   : > { %p626_p4 = pnand %p625_p3, %p621_p0 }
  0x1a   : > { %629 = shalt.err (!%p626_p4)
}
  0x1b   : > { %s630_s18 = scalar_lea.vmem %s171_s4, 128  ;;  %s741_s19 = smov [#allocation4]  }
  0x1c   : > { %p631_p5 = scmp.ne.s32.totalorder %s171_s4, %s630_s18  ;;  %s635_s26 = sshll.u32 %s741_s19, 4  ;;  %s636_s26 = int_to_ptr.vmem [resolvable:$false] %s635_s26 }
  0x1d   : > { %s637_s27 = scalar_lea.vmem %s636_s26, 256  ;;  %p638_p11 = scmp.lt.s32.totalorder %s171_s4, %s636_s26 }
  0x1e   : > { %p633_p6 = pnand %p631_p5, %p834_p12  ;;  %p639_p13 = scmp.lt.s32.totalorder %s637_s27, %s630_s18 }
  0x20   : > { %p634_p9 = pneg %p633_p6  ;;  %p640_p10 = por %p639_p13, %p638_p11 }
  0x22   : > { %p641_p7 = pnand %p640_p10, %p634_p9 }
  0x24   : > { %644 = shalt.err (!%p641_p7)
}
  0x25   : > { %566 = dma.hbm_to_vmem [thread:$0]  (!%p814_p8), %s823_s29, 128, %s171_s4, %s828_s5  }
  0x26   : > { %p957_p0 = scmp.lt.s32.totalorder %s739_s15, 3  ;;  %p958_p1 = scmp.ge.s32.totalorder %s739_s15, 1 }
  0x27   : > { %s865_s8 = scalar_lea.hbm %s949_s0, %s812_s24  ;;  %s145_s9 = scalar_lea.vmem [#allocation2], %s809_s23 }
  0x28   : > { %p857_p2 = pnand %p958_p1, %p957_p0  ;;  %s152_s10 = sshll.u32 %s145_s9, 4  ;;  %s153_s10 = int_to_ptr.vmem [resolvable:$true] %s152_s10 }
  0x29   : > { %s872_s29 = scalar_lea.hbm %s951_s2, %s812_s24  ;;  %s142_s15 = scalar_lea.sflag [#allocation3], %s141_s22 }
  0x2a   : > { %s959_s28 = scalar_select %p857_p2, 1, 0 }
  0x2b   : > { %s645_s4 = scalar_lea.hbm %s865_s8, 128  ;;  %s650_s26 = scalar_lea.hbm %s949_s0, 256 }
  0x2c   : > { %p646_p7 = scmp.ne.s32.totalorder %s865_s8, %s645_s4  ;;  %p651_p3 = scmp.lt.s32.totalorder %s865_s8, %s949_s0 }
  0x2d   : > { %p652_p4 = scmp.lt.s32.totalorder %s650_s26, %s645_s4 }
  0x2e   : > { %p648_p9 = pnand %p646_p7, %p834_p12 }
  0x2f   : > { %p653_p5 = por %p652_p4, %p651_p3 }
  0x30   : > { %p649_p10 = pneg %p648_p9 }
  0x32   : > { %p654_p6 = pnand %p653_p5, %p649_p10 }
  0x34   : > { %657 = shalt.err (!%p654_p6)
}
  0x35   : > { %s658_s24 = scalar_lea.vmem %s153_s10, 128  ;;  %s742_s22 = smov [#allocation2]  }
  0x36   : > { %p659_p11 = scmp.ne.s32.totalorder %s153_s10, %s658_s24  ;;  %s663_s6 = sshll.u32 %s742_s22, 4  ;;  %s664_s6 = int_to_ptr.vmem [resolvable:$false] %s663_s6 }
  0x37   : > { %s665_s9 = scalar_lea.vmem %s664_s6, 256  ;;  %p666_p1 = scmp.lt.s32.totalorder %s153_s10, %s664_s6 }
  0x38   : > { %p661_p13 = pnand %p659_p11, %p834_p12  ;;  %p667_p7 = scmp.lt.s32.totalorder %s665_s9, %s658_s24 }
  0x3a   : > { %p662_p0 = pneg %p661_p13  ;;  %p668_p9 = por %p667_p7, %p666_p1 }
  0x3c   : > { %p669_p2 = pnand %p668_p9, %p662_p0 }
  0x3e   : > { %672 = shalt.err (!%p669_p2)
}
  0x3f   : > { %563 = dma.hbm_to_vmem [thread:$0]  (!%p814_p8), %s865_s8, 128, %s153_s10, %s142_s15  }
  0x40   : > { %s181_s11 = scalar_lea.vmem [#allocation6], %s809_s23  ;;  %s673_s4 = scalar_lea.hbm %s872_s29, 128 }
  0x41   : > { %s188_s12 = sshll.u32 %s181_s11, 4  ;;  %p674_p10 = scmp.ne.s32.totalorder %s872_s29, %s673_s4  ;;  %s189_s12 = int_to_ptr.vmem [resolvable:$true] %s188_s12 }
  0x42   : > { %s678_s26 = scalar_lea.hbm %s951_s2, 256  ;;  %p679_p2 = scmp.lt.s32.totalorder %s872_s29, %s951_s2 }
  0x43   : > { %p676_p3 = pnand %p674_p10, %p834_p12  ;;  %p680_p5 = scmp.lt.s32.totalorder %s678_s26, %s673_s4 }
  0x45   : > { %p677_p4 = pneg %p676_p3  ;;  %p681_p6 = por %p680_p5, %p679_p2 }
  0x47   : > { %p682_p11 = pnand %p681_p6, %p677_p4 }
  0x49   : > { %685 = shalt.err (!%p682_p11)
}
  0x4a   : > { %s686_s23 = scalar_lea.vmem %s189_s12, 128  ;;  %s743_s8 = smov [#allocation6]  }
  0x4b   : > { %p687_p13 = scmp.ne.s32.totalorder %s189_s12, %s686_s23  ;;  %s691_s10 = sshll.u32 %s743_s8, 4  ;;  %s692_s10 = int_to_ptr.vmem [resolvable:$false] %s691_s10 }
  0x4c   : > { %s693_s15 = scalar_lea.vmem %s692_s10, 256  ;;  %p694_p7 = scmp.lt.s32.totalorder %s189_s12, %s692_s10 }
  0x4d   : > { %p689_p0 = pnand %p687_p13, %p834_p12  ;;  %p695_p9 = scmp.lt.s32.totalorder %s693_s15, %s686_s23 }
  0x4f   : > { %p690_p1 = pneg %p689_p0  ;;  %p696_p10 = por %p695_p9, %p694_p7 }
  0x51   : > { %p697_p3 = pnand %p696_p10, %p690_p1 }
  0x53   : > { %700 = shalt.err (!%p697_p3)
}
  0x54   : > { %569 = dma.hbm_to_vmem [thread:$0]  (!%p814_p8), %s872_s29, 128, %s189_s12, %s828_s5  }
  0x55   : > { %p960_p4 = scmp.ne.s32.totalorder %s959_s28, 0 }
  0x56   : > { %s199_s7 = sand.u32 (!%p960_p4), 1, %s731_s13   ;;  %p961_p12 = scmp.ne.s32.totalorder (!%p960_p4), %s954_s21, 0 }
  0x57   : > { %197 = sbr.rel (%p960_p4) target bundleno = 824 (0x338), region = 32  ;;  %s538_s24 = sshll.u32 (!%p960_p4), %s199_s7, 3 }
  0x58   : > { %s200_s22 = scalar_lea.sflag (!%p960_p4), [#allocation3], %s199_s7  ;;  %s203_s6 = scalar_lea.vmem (!%p960_p4), [#allocation2], %s538_s24 }
  0x5c   : > { %718 = dma.done.wait (%p961_p12), %s200_s22, 128  }
  0x5d   : > { %720 = vsyncadd (%p961_p12), %s200_s22, 4294967168  ;;  %s208_s25 = sand.u32 1, %s785_s16   ;;  %s212_s11 = scalar_lea.vmem [#allocation4], %s538_s24 }
  0x5e   : > { %s209_s9 = scalar_lea.sflag [#allocation5], %s208_s25 }
  0x5f   : > { %722 = dma.done.wait (%p961_p12), %s209_s9, 256  }
  0x60   : > { %724 = vsyncadd (%p961_p12), %s209_s9, 4294967040  ;;  %v744_v0 = vmov 0.0   ;;  %vm745_vm0 = vmmov 0   ;;  %vm259_vm1 = vcmask 261120   ;;  %s221_s5 = scalar_lea.vmem [#allocation6], %s538_s24  ;;  %v255_v2 = vld [vmem:[%s203_s6] sm:$0xff]  ;;  %v361_v16 = vlaneseq }
  0x61   : > { %547 = vmatprep.subr.mxu0 %v744_v0  ;;  %549 = vmatprep.mubr.msk.f32.mxu0 %vm745_vm0, %v744_v0  ;;  %v257_v1 = vld [vmem:[%s221_s5] sm:$0xff]  ;;  %v256_v3 = vld [vmem:[%s212_s11] sm:$0xff]  ;;  %v258_v4 = vmul.f32 %v255_v2, %v255_v2  ;;  %vm381_vm2 = vcmask 64512   ;;  %s400_s21 = ssub.s32 2, %s785_s16  ;;  %vm412_vm4 = vcmask 57344   ;;  %p252_p8 = scmp.lt.s32.totalorder %s785_s16, 1 }
  0x62   : > { %548 = vmatpush3.xpose.msk.msra.mxu0 %vm259_vm1, %v257_v1  ;;  %v265_v5 = vmul.f32 %v256_v3, %v256_v3  ;;  %v271_v6 = vmul.f32 %v257_v1, %v257_v1  ;;  %v277_v7 = vmul.f32 %v256_v3, %v255_v2  ;;  %v362_v17 = vand.u32 127, %v361_v16 }
  0x63   : > { %v260_v8 = vsel %vm259_vm1, %v258_v4, 0.0  ;;  %v364_v18 = vshrl.u32 %v361_v16, 7  ;;  %v403_v48 = vstv %s400_s21  ;;  %s967_s16 = smov (!%p252_p8, %s785_s16), 1  ;;  %vm424_vm5 = vcmask 0  }
  0x64   : > { %v266_v9 = vsel %vm259_vm1, %v265_v5, 0.0  ;;  %261 = vadd.xlane.f32.xlu0 %v260_v8  ;;  %v272_v10 = vsel %vm259_vm1, %v271_v6, 0.0  ;;  %v278_v11 = vsel %vm259_vm1, %v277_v7, 0.0  ;;  %s254_s12 = scalar_lea.vmem %s952_s3, %s967_s16 }
  0x65   : > { %550 = vmatmul.mubr.msk.f32.vlgmr.msra.gmra.mxu0 %vm259_vm1, %v255_v2  ;;  %267 = vadd.xlane.f32.xlu1 %v266_v9  ;;  %v365_v19 = vsub.s32 %v362_v17, %v364_v18  ;;  %vm404_vm3 = vcmp.lt.s32.totalorder %v364_v18, %v403_v48 }
  0x68   : > { %273 = vadd.xlane.f32.xlu0 %v272_v10 }
  0x69   : > { %279 = vadd.xlane.f32.xlu1 %v278_v11 }
  0xed   : > { %v262_v12 = vpop.xlane.xlu0 %261 }
  0xee   : > { %v263_v15 = vmax.f32 %v262_v12, 1e-16  ;;  %v268_v28 = vpop.xlane.xlu1 %267 }
  0xef   : > { %v269_v29 = vmax.f32 %v268_v28, 1e-16 }
  0xf1   : > { %v274_v13 = vpop.xlane.xlu0 %273 }
  0xf2   : > { %v275_v14 = vmax.f32 %v274_v13, 1e-16  ;;  %v280_v30 = vpop.xlane.xlu1 %279 }
  0xf4   : > { %605 = vrsqrt.f32 %v275_v14 }
  0xf5   : > { %607 = vrsqrt.f32 %v263_v15 }
  0xf6   : > { %609 = vrsqrt.f32 %v269_v29 }
 0x101   : > { %v606_v20 = vpop.eup %605 }
 0x102   : > { %v366_v21 = vrot.slane %v606_v20, %v365_v19  ;;  %v608_v22 = vpop.eup %607 }
 0x103   : > { %v281_v31 = vmul.f32 %v608_v22, %v280_v30  ;;  %v610_v32 = vpop.eup %609 }
 0x105   : > { %v282_v33 = vmul.f32 %v610_v32, %v281_v31 }
 0x125   : > { %v355_v23 = vpop.f32.mrf.mxu0 }
 0x126   : > { %v359_v24 = vmul.f32 %v608_v22, %v355_v23 }
 0x127   : > { %v551_v25 = vpop.f32.mrf.mxu0 }
 0x128   : > { %v380_v26 = vmul.f32 %v366_v21, %v359_v24 }
 0x12a   : > { %v382_v27 = vsel %vm381_vm2, %v380_v26, -inf }
 0x12b   : > { %383 = vmax.xlane.f32.xlu0 %v382_v27 }
 0x1b4   : > { %v384_v34 = vpop.xlane.xlu0 %383 }
 0x1b5   : > { %v385_v35 = vmax.f32 %v384_v34, %v282_v33 }
 0x1b7   : > { %v386_v36 = vsub.f32 %v380_v26, %v385_v35  ;;  %v392_v40 = vsub.f32 %v282_v33, %v385_v35 }
 0x1b9   : > { %v387_v37 = vmul.f32 1.442695, %v386_v36  ;;  %v393_v41 = vmul.f32 1.442695, %v392_v40 }
 0x1bb   : > { %611 = vpow2.f32 %v387_v37 }
 0x1bc   : > { %613 = vpow2.f32 %v393_v41 }
 0x1c8   : > { %v612_v38 = vpop.eup %611 }
 0x1c9   : > { %v389_v39 = vsel %vm381_vm2, %v612_v38, 0.0  ;;  %v614_v42 = vpop.eup %613 }
 0x1ca   : > { %390 = vadd.xlane.f32.xlu1 %v389_v39 }
 0x253   : > { %v391_v43 = vpop.xlane.xlu1 %390 }
 0x254   : > { %v395_v44 = vadd.f32 %v614_v42, %v391_v43 }
 0x256   : > { %615 = vlog2.f32 %v395_v44 }
 0x263   : > { %v616_v45 = vpop.eup %615 }
 0x264   : > { %v397_v46 = vmul.f32 0.6931472, %v616_v45 }
 0x266   : > { %v398_v47 = vadd.f32 %v397_v46, %v385_v35 }
 0x268   : > { %v399_v49 = vsub.f32 %v398_v47, %v282_v33 }
 0x26a   : > { %v409_v50 = vrot.slane %v399_v49, %v365_v19 }
 0x26c   : > { %v411_v51 = vsel %vm404_vm3, %v409_v50, 0.0 }
 0x26d   : > { %v413_v52 = vsel %vm412_vm4, %v411_v51, 0.0 }
 0x26e   : > { %414 = vadd.xlane.f32.xlu0 %v413_v52 }
 0x2f7   : > { %v415_v53 = vpop.xlane.xlu0 %414 }
 0x2f8   : > { %v416_v54 = vrot.slane %v415_v53, 4 }
 0x2fa   : > { %v417_v55 = vadd.f32 %v416_v54, %v415_v53 }
 0x2fc   : > { %v418_v56 = vrot.slane %v417_v55, 2 }
 0x2fe   : > { %v419_v57 = vadd.f32 %v418_v56, %v417_v55 }
 0x300   : > { %v420_v58 = vrot.slane %v419_v57, 1 }
 0x302   : > { %v421_v59 = vadd.f32 %v420_v58, %v419_v57 }
 0x304   : > { %552 = vpush %v421_v59 }
 0x335   : > { %s553_s4 = spop %552 }
 0x336   : > { %v423_v60 = vstv %s553_s4 }
 0x337   : > { %425 = vst.msk [vmem:[%s254_s12] sm:$0x1] %vm424_vm5, %v423_v60 }
 0x338 PF: > { %p16_p2 = scmp.ge.s32.totalorder %s788_s17, 4   ;;  %s962_s12 = smov %s731_s13 }
 0x339   : > { %s963_s13 = smov %s735_s14  ;;  %s964_s14 = smov %s798_s20 }
 0x33a   : > { %s965_s15 = smov %s788_s17  ;;  %18 = sbr.rel (!%p16_p2) target bundleno = 5 (0x5), region = 96 }
 0x33f   :  { %443 = vsyncpa [#allocation3], 1 }
 0x340   :  { %445 = vsyncpa [#allocation3 + $0x1], 1 }
 0x341   :  { %446 = vsyncpa [#allocation5], 1 }
 0x342   :  { %448 = vsyncpa [#allocation5 + $0x1], 1 }

</bundles_post_ra>
